<compile_context>
chip_gen: v7x
topology: tpu7x:2x2x1
jax: 0.10.0
libtpu: 0.0.40
codegen_flags: <defaults>
</compile_context>

<pallas_src>
import functools
from math import sqrt

import jax
import jax.numpy as jnp
from jax import lax
from jax.experimental import pallas as pl
from jax.experimental.pallas import tpu as pltpu


def _round_up(x, m):
    return (x + m - 1) // m * m


def _fused_convblock_kernel(x_ref, w1_ref, b1_ref, w2_ref, b2_ref, o_ref,
                            *, k1, k2, pad2, tile_l, l1_len, negative_slope):
    """One (batch, L2-tile) grid step of ConvBlock (downsample=False).

    x_ref : (XT, C_in)   halo'd input rows, XT = tile_l + k1 + k2 - 2 (compute dtype)
    w1_ref: (k1, C_in, Cp)  per-tap layer-1 weights, Cp = C_out padded to 128
    b1_ref: (1, Cp)         layer-1 bias (f32, zero in padded lanes)
    w2_ref: (k2, Cp, Cp)    per-tap layer-2 weights (zero padded rows/cols)
    b2_ref: (1, Cp)
    o_ref : (tile_l, Cp)    layer-2 output tile (f32, lane-dense)
    """
    cp = o_ref.shape[-1]
    ht = tile_l + k2 - 1                 # layer-1 rows this tile needs (with halo)
    xw = x_ref[...]

    # ---- layer 1: EqualConv1d + bias + LeakyReLU (f32 accumulation on MXU) ----
    h = jnp.zeros((ht, cp), jnp.float32)
    for tap in range(k1):                # static unroll; taps accumulate in f32
        h = h + jnp.dot(xw[tap:tap + ht, :], w1_ref[tap],
                        preferred_element_type=jnp.float32)
    h = h + b1_ref[...]
    h = jnp.where(h >= 0.0, h, negative_slope * h)

    # Rows outside the valid layer-1 output range are the pad2 zero-padding of h
    # for layer 2 (NOT conv1 applied to over-padded x) -> force them to zero.
    t = pl.program_id(1)
    row = t * tile_l - pad2 + lax.broadcasted_iota(jnp.int32, (ht, 1), 0)
    h = jnp.where((row >= 0) & (row < l1_len), h, 0.0)
    h = h.astype(xw.dtype)               # bf16 (or f32) for the second MXU pass

    # ---- layer 2: EqualConv1d + bias + LeakyReLU; h never leaves VMEM ----
    acc = jnp.zeros((tile_l, cp), jnp.float32)
    for tap in range(k2):
        acc = acc + jnp.dot(h[tap:tap + tile_l, :], w2_ref[tap],
                            preferred_element_type=jnp.float32)
    acc = acc + b2_ref[...]
    acc = jnp.where(acc >= 0.0, acc, negative_slope * acc)
    o_ref[...] = acc.astype(o_ref.dtype)


def conv_block(x, w1_orig, b1, w2_orig, b2, *, pad1, pad2,
               negative_slope=0.2, compute_dtype=jnp.bfloat16, tile_l=512):
    """ConvBlock.forward (downsample=False). x: (N, C_in, L) -> (N, C_out, L2)."""
    n, c_in, l = x.shape
    c_out, c_in_w, k1 = w1_orig.shape
    c_out2, c_out_w, k2 = w2_orig.shape
    assert c_in == c_in_w and c_out == c_out_w and c_out == c_out2

    l1 = l + 2 * pad1 - k1 + 1          # layer-1 output length
    l2 = l1 + 2 * pad2 - k2 + 1          # layer-2 output length
    assert l1 >= 1 and l2 >= 1

    # Equalized-LR scaling (EqualLR.compute_weight): fan_in = C_in * K.
    w1 = w1_orig.astype(jnp.float32) * jnp.float32(sqrt(2.0 / (c_in * k1)))
    w2 = w2_orig.astype(jnp.float32) * jnp.float32(sqrt(2.0 / (c_out * k2)))

    cp = _round_up(c_out, 128)           # lane-dense output channels
    tl = min(_round_up(tile_l, 8), _round_up(l2, 8))
    nt = pl.cdiv(l2, tl)
    l2_p = nt * tl
    ht = tl + k2 - 1                     # layer-1 rows per tile
    xt = ht + k1 - 1                     # input rows per tile (halo'd)

    # --- halo'd channels-last row slabs: only (k1+k2-2) rows duplicated per
    #     tile; no K x im2col expansion, no 128-wide contraction pad in HBM. ---
    x_nlc = jnp.transpose(x, (0, 2, 1))                        # (N, L, C_in)
    left = pad1 + pad2
    total = l2_p + k1 + k2 - 2
    right = total - (l + left)
    x_pad = jnp.pad(x_nlc, ((0, 0), (left, right), (0, 0)))
    x_tiles = jnp.stack([x_pad[:, t * tl:t * tl + xt, :] for t in range(nt)],
                        axis=1).astype(compute_dtype)          # (N, nt, XT, C_in)

    # --- per-tap weights; output channels zero-padded to a lane multiple ---
    w1_t = jnp.transpose(w1, (2, 1, 0))                        # (k1, C_in, C_out)
    w1_t = jnp.pad(w1_t, ((0, 0), (0, 0), (0, cp - c_out))).astype(compute_dtype)
    w2_p = jnp.pad(w2, ((0, 0), (0, cp - c_out), (0, 0)))      # pad layer-2 in-ch
    w2_t = jnp.transpose(w2_p, (2, 1, 0))                      # (k2, Cp, C_out)
    w2_t = jnp.pad(w2_t, ((0, 0), (0, 0), (0, cp - c_out))).astype(compute_dtype)
    b1_p = jnp.pad(b1.astype(jnp.float32), (0, cp - c_out)).reshape(1, cp)
    b2_p = jnp.pad(b2.astype(jnp.float32), (0, cp - c_out)).reshape(1, cp)

    kernel = functools.partial(
        _fused_convblock_kernel, k1=k1, k2=k2, pad2=pad2,
        tile_l=tl, l1_len=l1, negative_slope=negative_slope)

    # VMEM budget from the real footprint (double-buffered tiles + weights),
    # capped so it stays safe on v7x's 64 MiB physical VMEM.
    csize = jnp.dtype(compute_dtype).itemsize
    x_tile_b = xt * c_in * csize
    o_tile_b = tl * cp * 4
    w_b = (k1 * c_in + k2 * cp) * cp * csize + 2 * cp * 4
    inter_b = (2 * ht + 2 * tl) * cp * 4
    need = 2 * (x_tile_b + o_tile_b) + 2 * w_b + inter_b
    vmem_limit = int(min(56 * 2**20, max(32 * 2**20, 2 * need)))

    flops = 2 * n * l2_p * (k1 * c_in + k2 * cp) * cp
    bytes_accessed = int(n * nt * (x_tile_b + o_tile_b) + w_b)

    out = pl.pallas_call(
        kernel,
        out_shape=jax.ShapeDtypeStruct((n, nt, tl, cp), jnp.float32),
        grid_spec=pltpu.PrefetchScalarGridSpec(
            num_scalar_prefetch=0,
            grid=(n, nt),
            in_specs=[
                pl.BlockSpec((None, None, xt, c_in), lambda i, j: (i, j, 0, 0)),
                pl.BlockSpec((k1, c_in, cp), lambda i, j: (0, 0, 0)),   # resident
                pl.BlockSpec((1, cp), lambda i, j: (0, 0)),             # resident
                pl.BlockSpec((k2, cp, cp), lambda i, j: (0, 0, 0)),     # resident
                pl.BlockSpec((1, cp), lambda i, j: (0, 0)),             # resident
            ],
            out_specs=pl.BlockSpec((None, None, tl, cp), lambda i, j: (i, j, 0, 0)),
        ),
        compiler_params=pltpu.CompilerParams(
            dimension_semantics=("parallel", "parallel"),
            vmem_limit_bytes=vmem_limit,
        ),
        cost_estimate=pl.CostEstimate(flops=flops, transcendentals=0,
                                      bytes_accessed=bytes_accessed),
    )(x_tiles, w1_t, b1_p, w2_t, b2_p)

    y = out.reshape(n, l2_p, cp)[:, :l2, :c_out]               # strip tile/lane pad
    return jnp.transpose(y, (0, 2, 1))


def _reference_conv_block(x, w1, b1, w2, b2, *, pad1, pad2, negative_slope=0.2):
    """Pure-JAX reference of the same forward pass (for verification)."""
    def layer(h, w, b, pad):
        c_out, c_in, k = w.shape
        ws = w * jnp.float32(sqrt(2.0 / (c_in * k)))
        out = lax.conv_general_dilated(
            h, ws, window_strides=(1,), padding=[(pad, pad)],
            dimension_numbers=("NCH", "OIH", "NCH"))
        out = out + b[None, :, None]
        return jnp.where(out >= 0.0, out, negative_slope * out)
    return layer(layer(x, w1, b1, pad1), w2, b2, pad2)


if __name__ == "__main__":
    # ConvBlock(in_channel=4, out_channel=8, kernel_size=3, padding=1), downsample=False
    N, C_IN, C_OUT, L = 2, 4, 8, 16
    K, PAD = 3, 1

    key = jax.random.PRNGKey(0)
    k1, k2, kx = jax.random.split(key, 3)
    x = jax.random.normal(kx, (N, C_IN, L), dtype=jnp.float32)
    # conv.weight.data.normal_() -> standard normal; conv.bias.data.zero_()
    w1 = jax.random.normal(k1, (C_OUT, C_IN, K), dtype=jnp.float32)
    b1 = jnp.zeros((C_OUT,), dtype=jnp.float32)
    w2 = jax.random.normal(k2, (C_OUT, C_OUT, K), dtype=jnp.float32)
    b2 = jnp.zeros((C_OUT,), dtype=jnp.float32)

    ref = _reference_conv_block(x, w1, b1, w2, b2, pad1=PAD, pad2=PAD)

    # f32 matmul-input path (tight check against the XLA conv reference).
    out_f32 = jax.block_until_ready(
        conv_block(x, w1, b1, w2, b2, pad1=PAD, pad2=PAD,
                   compute_dtype=jnp.float32))
    assert out_f32.shape == (N, C_OUT, L), out_f32.shape
    assert jnp.allclose(out_f32, ref, atol=1e-4, rtol=1e-4), \
        float(jnp.abs(out_f32 - ref).max())

    # Default bf16 matmul-input path (f32 accumulation + f32 epilogue).
    out_bf16 = jax.block_until_ready(
        conv_block(x, w1, b1, w2, b2, pad1=PAD, pad2=PAD))
    assert out_bf16.shape == (N, C_OUT, L), out_bf16.shape
    assert jnp.allclose(out_bf16, ref, atol=1.5e-1, rtol=1e-1), \
        float(jnp.abs(out_bf16 - ref).max())

    print("KERNEL_OK")
</pallas_src>

<mosaic_0001>
module attributes {stable_mosaic.version = 11 : i64} {
  func.func @_fused_convblock_kernel(%arg0: i32, %arg1: i32, %arg2: memref<1x1x20x4xf32, #tpu.memory_space<vmem>>, %arg3: memref<3x4x128xf32, #tpu.memory_space<vmem>>, %arg4: memref<1x128xf32, #tpu.memory_space<vmem>>, %arg5: memref<3x128x128xf32, #tpu.memory_space<vmem>>, %arg6: memref<1x128xf32, #tpu.memory_space<vmem>>, %arg7: memref<1x1x16x128xf32, #tpu.memory_space<vmem>>) attributes {dimension_semantics = [#tpu.dimension_semantics<parallel>, #tpu.dimension_semantics<parallel>], iteration_bounds = array<i64: 2, 1>, scalar_prefetch = 0 : i64, scratch_operands = 0 : i64, tpu.core_type = #tpu.core_type<tc>, window_params = [{transform_indices = @transform_0, window_bounds = array<i64: 1, 1, 20, 4>}, {pipeline_mode = #tpu.pipeline_mode<synchronous>, transform_indices = @transform_1, window_bounds = array<i64: 3, 4, 128>}, {pipeline_mode = #tpu.pipeline_mode<synchronous>, transform_indices = @transform_2, window_bounds = array<i64: 1, 128>}, {pipeline_mode = #tpu.pipeline_mode<synchronous>, transform_indices = @transform_3, window_bounds = array<i64: 3, 128, 128>}, {pipeline_mode = #tpu.pipeline_mode<synchronous>, transform_indices = @transform_4, window_bounds = array<i64: 1, 128>}, {transform_indices = @transform_5, window_bounds = array<i64: 1, 1, 16, 128>}]} {
    %c0 = arith.constant 0 : index
    %c0_0 = arith.constant 0 : index
    %c0_1 = arith.constant 0 : index
    %c0_2 = arith.constant 0 : index
    %0 = vector.load %arg2[%c0, %c0_0, %c0_1, %c0_2] : memref<1x1x20x4xf32, #tpu.memory_space<vmem>>, vector<1x1x20x4xf32>
    %1 = vector.shape_cast %0 : vector<1x1x20x4xf32> to vector<20x4xf32>
    %cst = arith.constant 0.000000e+00 : f32
    %2 = vector.broadcast %cst : f32 to vector<18x128xf32>
    %3 = vector.extract_strided_slice %1 {offsets = [0, 0], sizes = [18, 4], strides = [1, 1]} : vector<20x4xf32> to vector<18x4xf32>
    %c0_3 = arith.constant 0 : index
    %c0_4 = arith.constant 0 : index
    %c0_5 = arith.constant 0 : index
    %4 = vector.load %arg3[%c0_3, %c0_4, %c0_5] : memref<3x4x128xf32, #tpu.memory_space<vmem>>, vector<1x4x128xf32>
    %5 = vector.shape_cast %4 : vector<1x4x128xf32> to vector<4x128xf32>
    %cst_6 = arith.constant dense<0.000000e+00> : vector<18x128xf32>
    %6 = tpu.matmul %3, %5, %cst_6 {dimension_numbers = #tpu.dot_dimension_numbers<[1], [0], [0], [1], [0, 0, 1, 1], [], []>} : vector<18x4xf32>, vector<4x128xf32>, vector<18x128xf32> -> vector<18x128xf32>
    %7 = arith.addf %2, %6 : vector<18x128xf32>
    %8 = vector.extract_strided_slice %1 {offsets = [1, 0], sizes = [18, 4], strides = [1, 1]} : vector<20x4xf32> to vector<18x4xf32>
    %c1 = arith.constant 1 : index
    %c0_7 = arith.constant 0 : index
    %c0_8 = arith.constant 0 : index
    %9 = vector.load %arg3[%c1, %c0_7, %c0_8] : memref<3x4x128xf32, #tpu.memory_space<vmem>>, vector<1x4x128xf32>
    %10 = vector.shape_cast %9 : vector<1x4x128xf32> to vector<4x128xf32>
    %cst_9 = arith.constant dense<0.000000e+00> : vector<18x128xf32>
    %11 = tpu.matmul %8, %10, %cst_9 {dimension_numbers = #tpu.dot_dimension_numbers<[1], [0], [0], [1], [0, 0, 1, 1], [], []>} : vector<18x4xf32>, vector<4x128xf32>, vector<18x128xf32> -> vector<18x128xf32>
    %12 = arith.addf %7, %11 : vector<18x128xf32>
    %13 = vector.extract_strided_slice %1 {offsets = [2, 0], sizes = [18, 4], strides = [1, 1]} : vector<20x4xf32> to vector<18x4xf32>
    %c2 = arith.constant 2 : index
    %c0_10 = arith.constant 0 : index
    %c0_11 = arith.constant 0 : index
    %14 = vector.load %arg3[%c2, %c0_10, %c0_11] : memref<3x4x128xf32, #tpu.memory_space<vmem>>, vector<1x4x128xf32>
    %15 = vector.shape_cast %14 : vector<1x4x128xf32> to vector<4x128xf32>
    %cst_12 = arith.constant dense<0.000000e+00> : vector<18x128xf32>
    %16 = tpu.matmul %13, %15, %cst_12 {dimension_numbers = #tpu.dot_dimension_numbers<[1], [0], [0], [1], [0, 0, 1, 1], [], []>} : vector<18x4xf32>, vector<4x128xf32>, vector<18x128xf32> -> vector<18x128xf32>
    %17 = arith.addf %12, %16 : vector<18x128xf32>
    %c0_13 = arith.constant 0 : index
    %c0_14 = arith.constant 0 : index
    %18 = vector.load %arg4[%c0_13, %c0_14] : memref<1x128xf32, #tpu.memory_space<vmem>>, vector<1x128xf32>
    %19 = vector.broadcast %18 : vector<1x128xf32> to vector<18x128xf32>
    %20 = arith.addf %17, %19 : vector<18x128xf32>
    %cst_15 = arith.constant 0.000000e+00 : f32
    %21 = vector.broadcast %cst_15 : f32 to vector<18x128xf32>
    %22 = arith.cmpf oge, %20, %21 : vector<18x128xf32>
    %cst_16 = arith.constant 2.000000e-01 : f32
    %23 = vector.broadcast %cst_16 : f32 to vector<18x128xf32>
    %24 = arith.mulf %23, %20 : vector<18x128xf32>
    %25 = arith.select %22, %20, %24 : vector<18x128xi1>, vector<18x128xf32>
    %c16_i32 = arith.constant 16 : i32
    %26 = arith.muli %arg1, %c16_i32 : i32
    %c1_i32 = arith.constant 1 : i32
    %27 = arith.subi %26, %c1_i32 : i32
    %28 = tpu.iota {dimensions = array<i32: 0>} : vector<18x1xi32>
    %29 = vector.broadcast %27 : i32 to vector<18x1xi32>
    %30 = arith.addi %29, %28 : vector<18x1xi32>
    %c0_i32 = arith.constant 0 : i32
    %31 = vector.broadcast %c0_i32 : i32 to vector<18x1xi32>
    %32 = arith.cmpi sge, %30, %31 : vector<18x1xi32>
    %c16_i32_17 = arith.constant 16 : i32
    %33 = vector.broadcast %c16_i32_17 : i32 to vector<18x1xi32>
    %34 = arith.cmpi slt, %30, %33 : vector<18x1xi32>
    %35 = arith.andi %32, %34 : vector<18x1xi1>
    %cst_18 = arith.constant 0.000000e+00 : f32
    %36 = vector.shape_cast %35 : vector<18x1xi1> to vector<18x1xi1>
    %37 = vector.broadcast %36 : vector<18x1xi1> to vector<18x128xi1>
    %38 = vector.broadcast %cst_18 : f32 to vector<18x128xf32>
    %39 = arith.select %37, %25, %38 : vector<18x128xi1>, vector<18x128xf32>
    %cst_19 = arith.constant 0.000000e+00 : f32
    %40 = vector.broadcast %cst_19 : f32 to vector<16x128xf32>
    %41 = vector.extract_strided_slice %39 {offsets = [0, 0], sizes = [16, 128], strides = [1, 1]} : vector<18x128xf32> to vector<16x128xf32>
    %c0_20 = arith.constant 0 : index
    %c0_21 = arith.constant 0 : index
    %c0_22 = arith.constant 0 : index
    %42 = vector.load %arg5[%c0_20, %c0_21, %c0_22] : memref<3x128x128xf32, #tpu.memory_space<vmem>>, vector<1x128x128xf32>
    %43 = vector.shape_cast %42 : vector<1x128x128xf32> to vector<128x128xf32>
    %cst_23 = arith.constant dense<0.000000e+00> : vector<16x128xf32>
    %44 = tpu.matmul %41, %43, %cst_23 {dimension_numbers = #tpu.dot_dimension_numbers<[1], [0], [0], [1], [0, 0, 1, 1], [], []>} : vector<16x128xf32>, vector<128x128xf32>, vector<16x128xf32> -> vector<16x128xf32>
    %45 = arith.addf %40, %44 : vector<16x128xf32>
    %46 = vector.extract_strided_slice %39 {offsets = [1, 0], sizes = [16, 128], strides = [1, 1]} : vector<18x128xf32> to vector<16x128xf32>
    %c1_24 = arith.constant 1 : index
    %c0_25 = arith.constant 0 : index
    %c0_26 = arith.constant 0 : index
    %47 = vector.load %arg5[%c1_24, %c0_25, %c0_26] : memref<3x128x128xf32, #tpu.memory_space<vmem>>, vector<1x128x128xf32>
    %48 = vector.shape_cast %47 : vector<1x128x128xf32> to vector<128x128xf32>
    %cst_27 = arith.constant dense<0.000000e+00> : vector<16x128xf32>
    %49 = tpu.matmul %46, %48, %cst_27 {dimension_numbers = #tpu.dot_dimension_numbers<[1], [0], [0], [1], [0, 0, 1, 1], [], []>} : vector<16x128xf32>, vector<128x128xf32>, vector<16x128xf32> -> vector<16x128xf32>
    %50 = arith.addf %45, %49 : vector<16x128xf32>
    %51 = vector.extract_strided_slice %39 {offsets = [2, 0], sizes = [16, 128], strides = [1, 1]} : vector<18x128xf32> to vector<16x128xf32>
    %c2_28 = arith.constant 2 : index
    %c0_29 = arith.constant 0 : index
    %c0_30 = arith.constant 0 : index
    %52 = vector.load %arg5[%c2_28, %c0_29, %c0_30] : memref<3x128x128xf32, #tpu.memory_space<vmem>>, vector<1x128x128xf32>
    %53 = vector.shape_cast %52 : vector<1x128x128xf32> to vector<128x128xf32>
    %cst_31 = arith.constant dense<0.000000e+00> : vector<16x128xf32>
    %54 = tpu.matmul %51, %53, %cst_31 {dimension_numbers = #tpu.dot_dimension_numbers<[1], [0], [0], [1], [0, 0, 1, 1], [], []>} : vector<16x128xf32>, vector<128x128xf32>, vector<16x128xf32> -> vector<16x128xf32>
    %55 = arith.addf %50, %54 : vector<16x128xf32>
    %c0_32 = arith.constant 0 : index
    %c0_33 = arith.constant 0 : index
    %56 = vector.load %arg6[%c0_32, %c0_33] : memref<1x128xf32, #tpu.memory_space<vmem>>, vector<1x128xf32>
    %57 = vector.broadcast %56 : vector<1x128xf32> to vector<16x128xf32>
    %58 = arith.addf %55, %57 : vector<16x128xf32>
    %cst_34 = arith.constant 0.000000e+00 : f32
    %59 = vector.broadcast %cst_34 : f32 to vector<16x128xf32>
    %60 = arith.cmpf oge, %58, %59 : vector<16x128xf32>
    %cst_35 = arith.constant 2.000000e-01 : f32
    %61 = vector.broadcast %cst_35 : f32 to vector<16x128xf32>
    %62 = arith.mulf %61, %58 : vector<16x128xf32>
    %63 = arith.select %60, %58, %62 : vector<16x128xi1>, vector<16x128xf32>
    %c0_36 = arith.constant 0 : index
    %c0_37 = arith.constant 0 : index
    %c0_38 = arith.constant 0 : index
    %c0_39 = arith.constant 0 : index
    %64 = vector.load %arg7[%c0_36, %c0_37, %c0_38, %c0_39] : memref<1x1x16x128xf32, #tpu.memory_space<vmem>>, vector<1x1x16x128xf32>
    %65 = vector.shape_cast %64 : vector<1x1x16x128xf32> to vector<16x128xf32>
    %66 = vector.shape_cast %63 : vector<16x128xf32> to vector<1x1x16x128xf32>
    tpu.vector_store %arg7[%c0_36, %c0_37, %c0_38, %c0_39], %66 {strides = array<i32>} : memref<1x1x16x128xf32, #tpu.memory_space<vmem>>, vector<1x1x16x128xf32>,
    return
  }
  func.func @transform_0(%arg0: i32, %arg1: i32) -> (i32, i32, i32, i32) {
    %c0_i32 = arith.constant 0 : i32
    %c0_i32_0 = arith.constant 0 : i32
    %c0_i32_1 = arith.constant 0 : i32
    return %arg0, %arg1, %c0_i32, %c0_i32_0 : i32, i32, i32, i32
  }
  func.func @transform_1(%arg0: i32, %arg1: i32) -> (i32, i32, i32) {
    %c0_i32 = arith.constant 0 : i32
    %c0_i32_0 = arith.constant 0 : i32
    %c0_i32_1 = arith.constant 0 : i32
    %c0_i32_2 = arith.constant 0 : i32
    return %c0_i32, %c0_i32_0, %c0_i32_1 : i32, i32, i32
  }
  func.func @transform_2(%arg0: i32, %arg1: i32) -> (i32, i32) {
    %c0_i32 = arith.constant 0 : i32
    %c0_i32_0 = arith.constant 0 : i32
    %c0_i32_1 = arith.constant 0 : i32
    return %c0_i32, %c0_i32_0 : i32, i32
  }
  func.func @transform_3(%arg0: i32, %arg1: i32) -> (i32, i32, i32) {
    %c0_i32 = arith.constant 0 : i32
    %c0_i32_0 = arith.constant 0 : i32
    %c0_i32_1 = arith.constant 0 : i32
    %c0_i32_2 = arith.constant 0 : i32
    return %c0_i32, %c0_i32_0, %c0_i32_1 : i32, i32, i32
  }
  func.func @transform_4(%arg0: i32, %arg1: i32) -> (i32, i32) {
    %c0_i32 = arith.constant 0 : i32
    %c0_i32_0 = arith.constant 0 : i32
    %c0_i32_1 = arith.constant 0 : i32
    return %c0_i32, %c0_i32_0 : i32, i32
  }
  func.func @transform_5(%arg0: i32, %arg1: i32) -> (i32, i32, i32, i32) {
    %c0_i32 = arith.constant 0 : i32
    %c0_i32_0 = arith.constant 0 : i32
    %c0_i32_1 = arith.constant 0 : i32
    return %arg0, %arg1, %c0_i32, %c0_i32_0 : i32, i32, i32, i32
  }
}

</mosaic_0001>

<bundles_post_ra>
// kernel: tpu_custom_call.1
= control target key start
LH: loop header
LB: loop body
LE: loop exit
PB: predicated region body
PF: predicated region fallthrough
CT: control target
= control target key end

     0   :  { %10 = vsyncpa [#allocation3], 0  ;;  %s1790_s0 = inlined_call_operand.vmem [shape: f32[2,1,20,4], index: 0, kind: input, shape index: {}]   ;;  %s1791_s1 = inlined_call_operand.vmem [shape: f32[3,4,128], index: 1, kind: input, shape index: {}]   ;;  %s1792_s2 = inlined_call_operand.vmem [shape: f32[1,128], index: 2, kind: input, shape index: {}]   ;;  %s1793_s3 = inlined_call_operand.hbm [shape: f32[3,128,128], index: 3, kind: input, shape index: {}]   ;;  %s1794_s4 = inlined_call_operand.vmem [shape: f32[1,128], index: 4, kind: input, shape index: {}]   ;;  %s1795_s5 = inlined_call_operand.hbm [shape: f32[2,1,16,128], index: 5, kind: output, shape index: {}]  }
   0x1   :  { %11 = vsyncpa [#allocation4], 0 }
   0x2   :  { %13 = vsyncpa [#allocation4 + $0x1], 0  ;;  %s1588_s18 = smov 0   ;;  %s1590_s19 = smov 0  }
   0x3   :  { %s1592_s20 = smov 0   ;;  %s1594_s21 = smov 0  }
   0x4   :  { %s1596_s22 = smov 0   ;;  %s1598_s23 = smov 0  }
   0x5 LB: > { %s1029_s24 = sadd.s32 4294967295, %s1548_s23   ;;  %s1030_s25 = sadd.s32 4294967294, %s1548_s23   ;;  %s1548_s23 = sphi %s1598_s23, %s19_s23   ;;  %s1544_s22 = sphi %s1596_s22, %s1813_s22   ;;  %s1540_s21 = sphi %s1594_s21, %s1812_s21   ;;  %s1536_s20 = sphi %s1592_s20, %s1811_s20   ;;  %s1532_s19 = sphi %s1590_s19, %s1810_s19   ;;  %s1528_s18 = sphi %s1588_s18, %s1809_s18  }
   0x6   : > { %s31_s26 = sadd.s32 1, %s1544_s22  ;;  %s152_s27 = sadd.s32 1, %s1536_s20 }
   0x7   : > { %p33_p0 = scmp.ge.s32.totalorder %s31_s26, 2  ;;  %p162_p1 = scmp.ne.s32.totalorder %s1536_s20, %s1532_s19 }
   0x8   : > { %p163_p2 = scmp.eq.s32.totalorder %s1029_s24, 1  ;;  %p168_p3 = scmp.ne.s32.totalorder %s1532_s19, %s1528_s18 }
   0x9   : > { %s1815_s26 = smov (%p33_p0, %s31_s26), 0  ;;  %p169_p5 = scmp.eq.s32.totalorder %s1030_s25, 1 }
   0xa   : > { %p1628_p4 = por %p163_p2, %p162_p1  ;;  %s147_s29 = ssub.s32 %s1544_s22, %s1815_s26 }
   0xb   : > { %p1031_p6 = scmp.ge.s32.totalorder %s1548_s23, 1  ;;  %p150_p7 = scmp.eq.s32.totalorder %s147_s29, 0 }
   0xc   : > { %s1800_s28 = scalar_select %p1628_p4, 1, 0 }
   0xd   : > { %p1635_p8 = por %p169_p5, %p168_p3  ;;  %p176_p9 = scmp.lt.s32.totalorder %s1548_s23, 3 }
   0xe   : > { %s1641_s6 = scalar_select %p150_p7, %s1536_s20, %s152_s27  }
   0xf   : > { %s1801_s30 = scalar_select %p1635_p8, 1, 0 }
  0x10   : > { %p1643_p10 = pnand %p1031_p6, %p176_p9  ;;  %p1647_p11 = scmp.eq.s32.totalorder %s1029_s24, 0 }
  0x11   : > { %s1550_s9 = smov [#allocation2]   ;;  %s1438_s14 = scalar_lea.hbm %s1793_s3, 6144 }
  0x12   : > { %s1802_s7 = scalar_select %p1643_p10, 1, 0 }
  0x13   : > { %s1803_s8 = scalar_select %p1647_p11, 1, 0 }
  0x14   : > { %p1372_p12 = pneg %p1643_p10  ;;  %s194_s10 = sshll.u32 %s1550_s9, 4  ;;  %s195_s10 = int_to_ptr.vmem [resolvable:$true] %s194_s10 }
  0x15   : > { %p1439_p0 = scmp.ne.s32.totalorder %s1793_s3, %s1438_s14  ;;  %p1445_p5 = scmp.lt.u32.totalorder %s1438_s14, %s1793_s3 }
  0x16   : > { %p1655_p13 = pnand %p1647_p11, %p1372_p12 }
  0x18   : > { %p1440_p1 = pneg %p1655_p13 }
  0x1a   : > { %p1441_p2 = pnand %p1440_p1, %p1439_p0 }
  0x1c   : > { %p1442_p3 = pneg %p1441_p2 }
  0x1e   : > { %p1447_p6 = pnand %p1445_p5, %p1442_p3 }
  0x20   : > { %1450 = shalt.err (!%p1447_p6)
}
  0x21   : > { %s1451_s25 = scalar_lea.vmem %s195_s10, 6144  ;;  %p1459_p8 = scmp.lt.s32.totalorder %s195_s10, %s195_s10 }
  0x22   : > { %p1452_p7 = scmp.ne.s32.totalorder %s195_s10, %s1451_s25  ;;  %p1460_p4 = scmp.lt.s32.totalorder %s1451_s25, %s1451_s25 }
  0x24   : > { %p1454_p9 = pnand %p1452_p7, %p1440_p1  ;;  %p1461_p11 = por %p1460_p4, %p1459_p8 }
  0x26   : > { %p1455_p12 = pneg %p1454_p9 }
  0x28   : > { %p1462_p10 = pnand %p1461_p11, %p1455_p12 }
  0x2a   : > { %1465 = shalt.err (!%p1462_p10)
}
  0x2b   : > { %s1551_s27 = smov 128   ;;  %s1552_s29 = smov 8  }
  0x2c   : > { %1375 = dma.hbm_to_vmem [thread:$0]  (!%p1655_p13), %s1793_s3, 6144, %s195_s10, [#allocation3], %s1551_s27, %s1551_s27, %s1552_s29  }
  0x2d   : > { %p1805_p0 = scmp.ne.s32.totalorder %s1802_s7, 0 }
  0x2e   : > { %p1806_p2 = scmp.ne.s32.totalorder (!%p1805_p0), %s1803_s8, 0 }
  0x2f   : > { %225 = sbr.rel (%p1805_p0) target bundleno = 580 (0x244), region = 40 }
  0x36   : > { %1519 = dma.done.wait (%p1806_p2), [#allocation3], 6144  }
  0x37   : > { %1521 = vsyncadd (%p1806_p2), [#allocation3], 4294961152  ;;  %p257_p4 = scmp.lt.s32.totalorder %s1540_s21, 1  ;;  %v1553_v0 = vmov 0.0   ;;  %vm1554_vm0 = vmmov 0   ;;  %vm288_vm1 = vcmask 1043456  }
  0x38   : > { %1127 = vmatprep.subr.mxu0 %v1553_v0  ;;  %1129 = vmatprep.mubr.msk.f32.mxu0 %vm1554_vm0, %v1553_v0  ;;  %v1038_v1 = vld [vmem:[%s1791_s1 + $0x4] sm:$0xf]  ;;  %vm275_vm2 = vcmask 1046528   ;;  %vm281_vm3 = vcmask 31744   ;;  %v269_v6 = vld [vmem:[%s1791_s1] sm:$0xf] }
  0x39   : > { %s258_s11 = scalar_select %p257_p4, %s1540_s21, 1  ;;  %1128 = vmatpush3.msk.msra.mxu0 %vm288_vm1, %v1038_v1  ;;  %v1047_v11 = vld [vmem:[%s1791_s1 + $0x8] sm:$0xf]  ;;  %vm463_vm4 = vcmask 1045504   ;;  %v608_v17 = vld [vmem:[#allocation2] sm:$0xff]  ;;  %v610_v20 = vld [vmem:[#allocation2 + $0x10] sm:$0xff] }
  0x3a   : > { %1138 = vmatprep.subr.mxu0 %v1553_v0  ;;  %v609_v18 = vld [vmem:[#allocation2 + $0x8] sm:$0xff]  ;;  %v611_v21 = vld [vmem:[#allocation2 + $0x18] sm:$0xff]  ;;  %v612_v23 = vld [vmem:[#allocation2 + $0x20] sm:$0xff]  ;;  %s254_s9 = sand.u32 1, %s1532_s19   ;;  %p1807_p10 = scmp.ne.s32.totalorder %s1800_s28, 0 }
  0x3b   : > { %s1365_s13 = smul.u32 24, %s258_s11  ;;  %v1297_v19 = vpack.c.bf16 %v609_v18, %v608_v17  ;;  %v1301_v22 = vpack.c.bf16 %v611_v21, %v610_v20  ;;  %v613_v24 = vld [vmem:[#allocation2 + $0x28] sm:$0xff]  ;;  %v625_v26 = vld [vmem:[#allocation2 + $0x80] sm:$0xff]  ;;  %v614_v29 = vld [vmem:[#allocation2 + $0x30] sm:$0xff]  ;;  %s1036_s12 = sshll.u32 %s254_s9, 4 }
  0x3c   : > { %v1305_v25 = vpack.c.bf16 %v613_v24, %v612_v23  ;;  %v626_v27 = vld [vmem:[#allocation2 + $0x88] sm:$0xff]  ;;  %v615_v30 = vld [vmem:[#allocation2 + $0x38] sm:$0xff]  ;;  %v627_v32 = vld [vmem:[#allocation2 + $0x90] sm:$0xff]  ;;  %s256_s10 = scalar_lea.vmem [#allocation5], %s1036_s12  ;;  %s1555_s24 = smov [#allocation5]  }
  0x3d   : > { %s265_s14 = scalar_lea.vmem %s1790_s0, %s1365_s13  ;;  %1298 = vmatprep.subr.bf16.mxu1 %v1297_v19  ;;  %v1265_v28 = vpack.c.bf16 %v626_v27, %v625_v26  ;;  %v1309_v31 = vpack.c.bf16 %v615_v30, %v614_v29  ;;  %v628_v33 = vld [vmem:[#allocation2 + $0x98] sm:$0xff]  ;;  %v616_v35 = vld [vmem:[#allocation2 + $0x40] sm:$0xff]  ;;  %v617_v36 = vld [vmem:[#allocation2 + $0x48] sm:$0xff]  ;;  %s935_s7 = sshll.u32 %s256_s10, 4  ;;  %s1737_s7 = int_to_ptr.vmem [resolvable:$true] %s935_s7 }
  0x3e   : > { %v266_v2 = vld [vmem:[%s265_s14] sm:$0xff]  ;;  %v267_v3 = vld [vmem:[%s265_s14 + $0x8] sm:$0xff]  ;;  %v268_v7 = vld [vmem:[%s265_s14 + $0x10] sm:$0xf]  ;;  %1300 = vmatpush3.bf16.msra.mxu1 %v1297_v19  ;;  %v1269_v34 = vpack.c.bf16 %v628_v33, %v627_v32  ;;  %v1313_v37 = vpack.c.bf16 %v617_v36, %v616_v35  ;;  %s1060_s14 = sshll.u32 %s1540_s21, 8  ;;  %s1744_s21 = scalar_lea.sflag [#allocation4], %s254_s9 }
  0x3f   : > { %v276_v4 = vrot.slane %v266_v2, 1  ;;  %v277_v5 = vrot.slane %v267_v3, 1  ;;  %v279_v9 = vrot.slane %v268_v7, 1  ;;  %v464_v12 = vrot.slane %v266_v2, 2  ;;  %1302 = vmatprep.subr.bf16.mxu1 %v1301_v22  ;;  %v629_v38 = vld [vmem:[#allocation2 + $0xa0] sm:$0xff]  ;;  %v630_v39 = vld [vmem:[#allocation2 + $0xa8] sm:$0xff]  ;;  %s1742_s8 = scalar_lea.hbm %s1795_s5, %s1060_s14 }
  0x40   : > { %v465_v13 = vrot.slane %v267_v3, 2  ;;  %v467_v15 = vrot.slane %v268_v7, 2  ;;  %v1273_v40 = vpack.c.bf16 %v630_v39, %v629_v38  ;;  %v618_v41 = vld [vmem:[#allocation2 + $0x50] sm:$0xff]  ;;  %v619_v42 = vld [vmem:[#allocation2 + $0x58] sm:$0xff]  ;;  %v620_v47 = vld [vmem:[#allocation2 + $0x60] sm:$0xff]  ;;  %s1466_s17 = scalar_lea.vmem %s1737_s7, 256 }
  0x41   : > { %v278_v8 = vsel %vm275_vm2, %v276_v4, %v277_v5  ;;  %v280_v10 = vsel %vm275_vm2, %v277_v5, %v279_v9  ;;  %v1317_v43 = vpack.c.bf16 %v619_v42, %v618_v41  ;;  %v631_v44 = vld [vmem:[#allocation2 + $0xb0] sm:$0xff]  ;;  %v632_v45 = vld [vmem:[#allocation2 + $0xb8] sm:$0xff]  ;;  %v621_v48 = vld [vmem:[#allocation2 + $0x68] sm:$0xff]  ;;  %p1467_p8 = scmp.ne.s32.totalorder %s1737_s7, %s1466_s17  ;;  %s1470_s25 = sshll.u32 %s1555_s24, 4  ;;  %s1471_s25 = int_to_ptr.vmem [resolvable:$false] %s1470_s25 }
  0x42   : > { %1130 = vmatmul.mubr.msk.f32.vlgmr.msra.gmra.mrb[0].mxu0 %vm281_vm3, %v278_v8  ;;  %v466_v14 = vsel %vm463_vm4, %v464_v12, %v465_v13  ;;  %v468_v16 = vsel %vm463_vm4, %v465_v13, %v467_v15  ;;  %1304 = vmatpush3.bf16.msra.mxu1 %v1301_v22  ;;  %v1277_v46 = vpack.c.bf16 %v632_v45, %v631_v44  ;;  %v633_v50 = vld [vmem:[#allocation2 + $0xc0] sm:$0xff]  ;;  %v634_v51 = vld [vmem:[#allocation2 + $0xc8] sm:$0xff]  ;;  %v622_v53 = vld [vmem:[#allocation2 + $0x70] sm:$0xff]  ;;  %s1472_s27 = scalar_lea.vmem %s1471_s25, 512  ;;  %p1473_p1 = scmp.lt.s32.totalorder %s1737_s7, %s1471_s25 }
  0x43   : > { %1139 = vmatpush3.msk.msra.mxu0 %vm288_vm1, %v269_v6  ;;  %1132 = vmatprep.mubr.msk.f32.mxu0 %vm1554_vm0, %v1553_v0  ;;  %v1321_v49 = vpack.c.bf16 %v621_v48, %v620_v47  ;;  %v1281_v52 = vpack.c.bf16 %v634_v51, %v633_v50  ;;  %v623_v54 = vld [vmem:[#allocation2 + $0x78] sm:$0xff]  ;;  %v635_v56 = vld [vmem:[#allocation2 + $0xd0] sm:$0xff]  ;;  %v802_v59 = vld [vmem:[#allocation2 + $0x100] sm:$0xff]  ;;  %p1468_p11 = pnand %p1467_p8, %p1807_p10  ;;  %p1474_p3 = scmp.lt.s32.totalorder %s1472_s27, %s1466_s17 }
  0x44   : > { %1149 = vmatprep.subr.mxu0 %v1553_v0  ;;  %1306 = vmatprep.subr.bf16.mxu1 %v1305_v25  ;;  %v1325_v55 = vpack.c.bf16 %v623_v54, %v622_v53  ;;  %v636_v57 = vld [vmem:[#allocation2 + $0xd8] sm:$0xff]  ;;  %v803_v60 = vld [vmem:[#allocation2 + $0x108] sm:$0xff]  ;;  %v637_v62 = vld [vmem:[#allocation2 + $0xe0] sm:$0xff] }
  0x45   : > { %v1285_v58 = vpack.c.bf16 %v636_v57, %v635_v56  ;;  %v1720_v61 = vpack.c.bf16 %v803_v60, %v802_v59  ;;  %v638_v63 = vld [vmem:[#allocation2 + $0xe8] sm:$0xff]  ;;  %v639_v1 = vld [vmem:[#allocation2 + $0xf0] sm:$0xff]  ;;  %v1052_v22 = vld [vmem:[%s1792_s2] ss:$0 sm:$0xff]  ;;  %p1469_p13 = pneg %p1468_p11  ;;  %p1475_p5 = por %p1474_p3, %p1473_p1 }
  0x46   : > { %1133 = vmatmul.mubr.msk.f32.gmra.mrb[2].mxu0 %vm281_vm3, %v280_v10  ;;  %1308 = vmatpush3.bf16.msra.mxu1 %v1305_v25  ;;  %v804_v36 = vld [vmem:[#allocation2 + $0x110] sm:$0xff]  ;;  %v806_v47 = vld [vmem:[#allocation2 + $0x120] sm:$0xff]  ;;  %v807_v48 = vld [vmem:[#allocation2 + $0x128] sm:$0xff] }
  0x47   : > { %1135 = vmatprep.mubr.msk.f32.mxu0 %vm1554_vm0, %v1553_v0  ;;  %1310 = vmatprep.subr.bf16.mxu1 %v1309_v31  ;;  %v808_v57 = vld [vmem:[#allocation2 + $0x130] sm:$0xff]  ;;  %p1476_p6 = pnand %p1475_p5, %p1469_p13 }
  0x4a   : > { %1136 = vmatmul.mubr.msk.f32.gmra.mrb[4].mxu0 %vm281_vm3, %v279_v9  ;;  %1312 = vmatpush3.bf16.msra.mxu1 %v1309_v31 }
  0x4b   : > { %1140 = vmatprep.mubr.msk.f32.mxu0 %vm1554_vm0, %v1553_v0  ;;  %1314 = vmatprep.subr.bf16.mxu1 %v1313_v37 }
  0x4e   : > { %1141 = vmatmul.mubr.msk.f32.vlgmr.msra.gmra.mrb[6].mxu0 %vm281_vm3, %v266_v2  ;;  %1316 = vmatpush3.bf16.msra.mxu1 %v1313_v37  ;;  %v640_v2 = vld [vmem:[#allocation2 + $0xf8] sm:$0xff] }
  0x4f   : > { %1150 = vmatpush3.msk.msra.mxu0 %vm288_vm1, %v1047_v11  ;;  %1143 = vmatprep.mubr.msk.f32.mxu0 %vm1554_vm0, %v1553_v0  ;;  %v805_v37 = vld [vmem:[#allocation2 + $0x118] sm:$0xff] }
  0x50   : > { %1266 = vmatprep.subr.bf16.mxu0 %v1265_v28  ;;  %1318 = vmatprep.subr.bf16.mxu1 %v1317_v43 }
  0x52   : > { %1144 = vmatmul.mubr.msk.f32.gmra.mrb[8].mxu0 %vm281_vm3, %v267_v3  ;;  %1320 = vmatpush3.bf16.msra.mxu1 %v1317_v43  ;;  %v1293_v3 = vpack.c.bf16 %v640_v2, %v639_v1  ;;  %v1333_v43 = vpack.c.bf16 %v805_v37, %v804_v36  ;;  %v811_v1 = vld [vmem:[#allocation2 + $0x148] sm:$0xff] }
  0x53   : > { %1146 = vmatprep.mubr.msk.f32.mxu0 %vm1554_vm0, %v1553_v0  ;;  %1322 = vmatprep.subr.bf16.mxu1 %v1321_v49 }
  0x56   : > { %1147 = vmatmul.mubr.msk.f32.gmra.mrb[10].mxu0 %vm281_vm3, %v268_v7  ;;  %1324 = vmatpush3.bf16.msra.mxu1 %v1321_v49 }
  0x57   : > { %1151 = vmatprep.mubr.msk.f32.mxu0 %vm1554_vm0, %v1553_v0  ;;  %1326 = vmatprep.subr.bf16.mxu1 %v1325_v55 }
  0x5a   : > { %1152 = vmatmul.mubr.msk.f32.vlgmr.msra.gmra.mrb[12].mxu0 %vm281_vm3, %v466_v14  ;;  %1328 = vmatpush3.bf16.msra.mxu1 %v1325_v55  ;;  %v1337_v55 = vpack.c.bf16 %v807_v48, %v806_v47 }
  0x5b   : > { %1154 = vmatprep.mubr.msk.f32.mxu0 %vm1554_vm0, %v1553_v0  ;;  %1268 = vmatpush3.bf16.msra.mxu0 %v1265_v28 }
  0x5c   : > { %1270 = vmatprep.subr.bf16.mxu0 %v1269_v34  ;;  %1330 = vmatprep.subr.bf16.mxu1 %v1720_v61 }
  0x5e   : > { %1155 = vmatmul.mubr.msk.f32.gmra.mrb[14].mxu0 %vm281_vm3, %v468_v16  ;;  %v582_v16 = vlaneseq }
  0x5f   : > { %1157 = vmatprep.mubr.msk.f32.mxu0 %vm1554_vm0, %v1553_v0  ;;  %1272 = vmatpush3.bf16.msra.mxu0 %v1269_v34  ;;  %v1289_v0 = vpack.c.bf16 %v638_v63, %v637_v62 }
  0x60   : > { %1274 = vmatprep.subr.bf16.mxu0 %v1273_v40  ;;  %v583_v20 = vshrl.u32 %v582_v16, 7 }
  0x62   : > { %1158 = vmatmul.mubr.msk.f32.gmra.mrb[16].mxu0 %vm281_vm3, %v467_v15  ;;  %v587_v25 = vadd.s32 4294967295, %v583_v20  ;;  %v585_v28 = vadd.s32 16, %v583_v20 }
  0x63   : > { %1276 = vmatpush3.bf16.msra.mxu0 %v1273_v40 }
  0x64   : > { %1278 = vmatprep.subr.bf16.mxu0 %v1277_v46  ;;  %vm590_vm6 = vcmp.ge.s32.totalorder %v587_v25, 0  ;;  %v589_v35 = vadd.s32 4294967295, %v585_v28 }
  0x66   : > { %vm595_vm8 = vcmp.lt.s32.totalorder %v589_v35, 16 }
  0x67   : > { %1280 = vmatpush3.bf16.msra.mxu0 %v1277_v46 }
  0x68   : > { %1282 = vmatprep.subr.bf16.mxu0 %v1281_v52 }
  0x6b   : > { %1284 = vmatpush3.bf16.msra.mxu0 %v1281_v52 }
  0x6c   : > { %1286 = vmatprep.subr.bf16.mxu0 %v1285_v58 }
  0x6f   : > { %1288 = vmatpush3.bf16.msra.mxu0 %v1285_v58  ;;  %v809_v58 = vld [vmem:[#allocation2 + $0x138] sm:$0xff] }
  0x70   : > { %1290 = vmatprep.subr.bf16.mxu0 %v1289_v0 }
  0x73   : > { %1292 = vmatpush3.bf16.msra.mxu0 %v1289_v0  ;;  %v810_v0 = vld [vmem:[#allocation2 + $0x140] sm:$0xff] }
  0x74   : > { %1294 = vmatprep.subr.bf16.mxu0 %v1293_v3  ;;  %v1345_v2 = vpack.c.bf16 %v811_v1, %v810_v0 }
  0x77   : > { %1296 = vmatpush3.bf16.msra.mxu0 %v1293_v3  ;;  %v812_v3 = vld [vmem:[#allocation2 + $0x150] sm:$0xff] }
 0x115   : > { %v358_v4 = vpop.f32.mrb[0].mxu0 }
 0x116   : > { %v1131_v5 = vpop.f32.mrb[1].mxu0 }
 0x119   : > { %v363_v6 = vpop.f32.mrb[2].mxu0 }
 0x11a   : > { %v1134_v7 = vpop.f32.mrb[3].mxu0 }
 0x11b   : > { %v815_v7 = vld [vmem:[#allocation2 + $0x168] sm:$0xff] }
 0x11d   : > { %v368_v8 = vpop.f32.mrb[4].mxu0 }
 0x11e   : > { %v1137_v9 = vpop.f32.mrb[5].mxu0 }
 0x11f   : > { %v816_v9 = vld [vmem:[#allocation2 + $0x170] sm:$0xff] }
 0x121   : > { %v447_v10 = vpop.f32.mrb[6].mxu0 }
 0x122   : > { %v448_v11 = vadd.f32 %v447_v10, %v358_v4  ;;  %v1142_v12 = vpop.f32.mrb[7].mxu0  ;;  %v813_v4 = vld [vmem:[#allocation2 + $0x158] sm:$0xff] }
 0x123   : > { %v1349_v5 = vpack.c.bf16 %v813_v4, %v812_v3  ;;  %v817_v10 = vld [vmem:[#allocation2 + $0x178] sm:$0xff] }
 0x125   : > { %v452_v13 = vpop.f32.mrb[8].mxu0 }
 0x126   : > { %v453_v14 = vadd.f32 %v452_v13, %v363_v6  ;;  %v1145_v15 = vpop.f32.mrb[9].mxu0  ;;  %v814_v6 = vld [vmem:[#allocation2 + $0x160] sm:$0xff] }
 0x127   : > { %v1054_v15 = vld [vmem:[%s1794_s4] ss:$0 sm:$0xff] }
 0x129   : > { %v457_v17 = vpop.f32.mrb[10].mxu0 }
 0x12a   : > { %v458_v18 = vadd.f32 %v457_v17, %v368_v8  ;;  %v1148_v19 = vpop.f32.mrb[11].mxu0  ;;  %v1353_v8 = vpack.c.bf16 %v815_v7, %v814_v6 }
 0x12d   : > { %v544_v21 = vpop.f32.mrb[12].mxu0 }
 0x12e   : > { %v558_v23 = vadd.f32 %v544_v21, %v448_v11  ;;  %v1153_v24 = vpop.f32.mrb[13].mxu0  ;;  %v1357_v11 = vpack.c.bf16 %v817_v10, %v816_v9 }
 0x130   : > { %v568_v26 = vadd.f32 %v1052_v22, %v558_v23 }
 0x131   : > { %v549_v27 = vpop.f32.mrb[14].mxu0 }
 0x132   : > { %v559_v29 = vadd.f32 %v549_v27, %v453_v14  ;;  %v1156_v30 = vpop.f32.mrb[15].mxu0  ;;  %vm571_vm5 = vcmp.ge.f32.partialorder %v568_v26, 0.0  ;;  %v574_v31 = vmul.f32 0.2, %v568_v26 }
 0x134   : > { %v569_v32 = vadd.f32 %v1052_v22, %v559_v29  ;;  %v577_v33 = vsel %vm571_vm5, %v568_v26, %v574_v31 }
 0x135   : > { %v554_v34 = vpop.f32.mrb[16].mxu0  ;;  %1227 = vmatprep.mubr.msk.f32.mxu1 %vm590_vm6, %v577_v33  ;;  %v605_v39 = vsel %vm590_vm6, %v577_v33, 0.0 }
 0x136   : > { %v560_v38 = vadd.f32 %v554_v34, %v458_v18  ;;  %vm572_vm7 = vcmp.ge.f32.partialorder %v569_v32, 0.0  ;;  %v1159_v40 = vpop.f32.mrb[17].mxu0  ;;  %v575_v41 = vmul.f32 0.2, %v569_v32  ;;  %v644_v44 = vrot.slane %v605_v39, 1 }
 0x137   : > { %v818_v45 = vrot.slane %v605_v39, 2 }
 0x138   : > { %v570_v42 = vadd.f32 %v1052_v22, %v560_v38  ;;  %v578_v46 = vsel %vm572_vm7, %v569_v32, %v575_v41 }
 0x139   : > { %v645_v50 = vrot.slane %v578_v46, 1  ;;  %1228 = vmatmul.mubr.f32.vlgmr.msra.gmra.mrb[0].mxu1 %v578_v46  ;;  %v819_v51 = vrot.slane %v578_v46, 2 }
 0x13a   : > { %vm573_vm9 = vcmp.ge.f32.partialorder %v570_v42, 0.0  ;;  %v576_v49 = vmul.f32 0.2, %v570_v42  ;;  %1332 = vmatpush3.bf16.msra.mxu1 %v1720_v61  ;;  %v1341_v61 = vpack.c.bf16 %v809_v58, %v808_v57 }
 0x13b   : > { %v646_v53 = vsel %vm275_vm2, %v644_v44, %v645_v50  ;;  %1334 = vmatprep.subr.bf16.mxu1 %v1333_v43  ;;  %v820_v54 = vsel %vm463_vm4, %v818_v45, %v819_v51 }
 0x13c   : > { %v579_v52 = vsel %vm573_vm9, %v570_v42, %v576_v49  ;;  %1192 = vmatprep.mubr.f32.mxu0 %v646_v53  ;;  %1262 = vmatprep.mubr.f32.mxu1 %v820_v54 }
 0x13d   : > { %v607_v56 = vsel %vm595_vm8, %v579_v52, 0.0 }
 0x13e   : > { %v647_v59 = vrot.slane %v607_v56, 1  ;;  %v821_v60 = vrot.slane %v607_v56, 2  ;;  %1336 = vmatpush3.bf16.msra.mxu1 %v1333_v43 }
 0x13f   : > { %1338 = vmatprep.subr.bf16.mxu1 %v1337_v55 }
 0x140   : > { %v648_v62 = vsel %vm275_vm2, %v645_v50, %v647_v59  ;;  %v822_v63 = vsel %vm463_vm4, %v819_v51, %v821_v60 }
 0x141   : > { %1193 = vmatmul.mubr.f32.vlgmr.msra.gmra.mrb[18].mxu0 %v648_v62 }
 0x142   : > { %1340 = vmatpush3.bf16.msra.mxu1 %v1337_v55 }
 0x143   : > { %1342 = vmatprep.subr.bf16.mxu1 %v1341_v61 }
 0x146   : > { %1344 = vmatpush3.bf16.msra.mxu1 %v1341_v61 }
 0x147   : > { %1346 = vmatprep.subr.bf16.mxu1 %v1345_v2 }
 0x14a   : > { %1348 = vmatpush3.bf16.msra.mxu1 %v1345_v2 }
 0x14b   : > { %1350 = vmatprep.subr.bf16.mxu1 %v1349_v5 }
 0x14e   : > { %1352 = vmatpush3.bf16.msra.mxu1 %v1349_v5 }
 0x14f   : > { %1354 = vmatprep.subr.bf16.mxu1 %v1353_v8 }
 0x152   : > { %1356 = vmatpush3.bf16.msra.mxu1 %v1353_v8 }
 0x153   : > { %1358 = vmatprep.subr.bf16.mxu1 %v1357_v11 }
 0x156   : > { %1360 = vmatpush3.bf16.msra.mxu1 %v1357_v11 }
 0x159   : > { %1263 = vmatmul.mubr.f32.vlgmr.msra.gmra.mrb[0].mxu1 %v822_v63 }
 0x214   : > { %v1194_v12 = vpop.f32.mrb[18].mxu0 }
 0x215   : > { %v717_v13 = vpop.f32.mrb[19].mxu0 }
 0x22c   : > { %v1264_v14 = vpop.f32.mrb[0].mxu1 }
 0x22d   : > { %v1361_v16 = vadd.f32 %v1264_v14, %v1194_v12  ;;  %v891_v17 = vpop.f32.mrb[1].mxu1 }
 0x22e   : > { %v1362_v18 = vadd.f32 %v891_v17, %v717_v13 }
 0x22f   : > { %v910_v19 = vadd.f32 %v1361_v16, %v1054_v15 }
 0x230   : > { %v909_v20 = vadd.f32 %v1362_v18, %v1054_v15 }
 0x231   : > { %vm912_vm10 = vcmp.ge.f32.partialorder %v910_v19, 0.0  ;;  %v914_v21 = vmul.f32 0.2, %v910_v19 }
 0x232   : > { %vm911_vm11 = vcmp.ge.f32.partialorder %v909_v20, 0.0  ;;  %v913_v22 = vmul.f32 0.2, %v909_v20 }
 0x233   : > { %v916_v23 = vsel %vm912_vm10, %v910_v19, %v914_v21 }
 0x234   : > { %918 = vst [vmem:[%s256_s10 + $0x8] sm:$0xff] %v916_v23  ;;  %v915_v24 = vsel %vm911_vm11, %v909_v20, %v913_v22 }
 0x235   : > { %917 = vst [vmem:[%s256_s10] sm:$0xff] %v915_v24 }
 0x236   : > { %1479 = shalt.err (!%p1476_p6)
}
 0x237   : > { %s1480_s29 = scalar_lea.hbm %s1742_s8, 256  ;;  %s1484_s11 = scalar_lea.hbm %s1795_s5, 512 }
 0x238   : > { %p1481_p7 = scmp.ne.s32.totalorder %s1742_s8, %s1480_s29  ;;  %p1485_p0 = scmp.lt.u32.totalorder %s1742_s8, %s1795_s5 }
 0x239   : > { %p1486_p2 = scmp.lt.u32.totalorder %s1484_s11, %s1480_s29  ;;  %p1488_p8 = scmp.lt.u32.totalorder %s1480_s29, %s1742_s8 }
 0x23a   : > { %p1482_p9 = pnand %p1481_p7, %p1807_p10 }
 0x23b   : > { %p1487_p4 = por %p1486_p2, %p1485_p0 }
 0x23c   : > { %p1483_p12 = pneg %p1482_p9 }
 0x23d   : > { %p1489_p11 = por %p1488_p8, %p1487_p4 }
 0x23f   : > { %p1490_p13 = pnand %p1489_p11, %p1483_p12 }
 0x241   : > { %1493 = shalt.err (!%p1490_p13)
}
 0x242   : > { %s1556_s14 = smov 128   ;;  %s1557_s15 = smov 8  }
 0x243   : > { %1370 = dma.vmem_to_hbm [thread:$0]  (%p1807_p10), %s1737_s7, 256, %s1742_s8, %s1744_s21, %s1556_s14, %s1556_s14, %s1557_s15  }
 0x244 PF: > { %p1382_p1 = scmp.ge.s32.totalorder %s1548_s23, 2  ;;  %s950_s16 = sand.u32 1, %s1528_s18  }
 0x245   : > { %p1808_p3 = scmp.ne.s32.totalorder %s1801_s30, 0  ;;  %s951_s17 = scalar_lea.sflag [#allocation4], %s950_s16 }
 0x247   : > { %p1377_p5 = pnand %p1382_p1, %p1808_p3 }
 0x249   : > { %1523 = dma.done.wait (!%p1377_p5), %s951_s17, 256  }
 0x24a   : > { %1525 = vsyncadd (!%p1377_p5), %s951_s17, 4294967040  ;;  %s19_s23 = sadd.s32 1, %s1548_s23   ;;  %s1809_s18 = smov %s1532_s19 }
 0x24b   : > { %p16_p6 = scmp.ge.s32.totalorder %s19_s23, 4   ;;  %s1810_s19 = smov %s1536_s20 }
 0x24c   : > { %s1811_s20 = smov %s1641_s6  ;;  %s1812_s21 = smov %s1544_s22 }
 0x24d   : > { %s1813_s22 = smov %s1815_s26  ;;  %18 = sbr.rel (!%p16_p6) target bundleno = 5 (0x5), region = 84 }
 0x254   :  { %956 = vsyncpa [#allocation3], 1 }
 0x255   :  { %958 = vsyncpa [#allocation3 + $0x1], 1 }
 0x256   :  { %959 = vsyncpa [#allocation4], 1 }
 0x257   :  { %961 = vsyncpa [#allocation4 + $0x1], 1 }

</bundles_post_ra>
